<compile_context>
chip_gen: v6e
topology: v6e:2x2x1
jax: 0.10.0
libtpu: 0.0.40
codegen_flags: <defaults>
</compile_context>

<pallas_src>
import jax
import jax.numpy as jnp
from jax.experimental import pallas as pl
from jax.experimental.pallas import tpu as pltpu


def _round_up(v, m):
    return (v + m - 1) // m * m


def _choose_tb(B, block_b):
    # Enough batch tiles to respect the per-tile cap, and at least 2 when B is
    # big enough so ("parallel",) can shard the batch across both v7x cores.
    n_tiles = max(pl.cdiv(B, block_b), 2 if B >= 32 else 1)
    tb = _round_up(pl.cdiv(B, n_tiles), 16)     # 16-row granularity
    return min(tb, _round_up(B, 8))             # f32 x/out tiles: 8-row sublane


def _vmem_limit_bytes():
    # ~25% headroom below physical VMEM for compiler scratch / pipeline bufs.
    try:
        cap = int(pltpu.get_tpu_info().vmem_capacity_bytes)
    except Exception:
        cap = 64 * 1024 * 1024  # conservative (v7x-sized) fallback
    return max(16 * 1024 * 1024, (cap * 3) // 4)


def _mlp_softmax_kernel(x_ref, w1_ref, b1_ref, w2_ref, b2_ref, o_ref):
    # hidden = relu(x @ W1 + b1): bf16 MXU matmul, f32 accumulation.
    x = x_ref[...].astype(jnp.bfloat16)
    h = jnp.dot(x, w1_ref[...], preferred_element_type=jnp.float32)
    h = jnp.maximum(h + b1_ref[...], 0.0)

    # logits = hidden @ W2 + b2.  Padded class columns carry b2 == -1e30
    # (baked in at prepare time), so no in-kernel masking is needed.
    logits = jnp.dot(h.astype(jnp.bfloat16), w2_ref[...],
                     preferred_element_type=jnp.float32)
    logits = logits + b2_ref[...]

    # Numerically stable softmax over the class axis (padded columns -> exp 0).
    m = jnp.max(logits, axis=1, keepdims=True)
    e = jnp.exp(logits - m)
    denom = jnp.sum(e, axis=1, keepdims=True)
    o_ref[...] = (e * pl.reciprocal(denom, approx=True)).astype(o_ref.dtype)


def prepare_params(w1, b1, w2, b2):
    """Pad / cast parameters ONCE, outside the per-call path.

    w1: (D_in, H), b1: (1, H), w2: (H, D_out), b2: (1, D_out)
    (weights stored transposed relative to PyTorch's (out, in) layout).
    Returns (w1p, b1p, w2p, b2p, d_out).
    """
    b1 = jnp.reshape(b1, (1, -1))
    b2 = jnp.reshape(b2, (1, -1))
    d_out = w2.shape[1]
    d_out_pad = _round_up(d_out, 128)           # lane-dense output store

    w1p = w1.astype(jnp.bfloat16)               # hidden dim left unpadded
    b1p = b1.astype(jnp.float32)
    w2p = jnp.pad(w2, ((0, 0), (0, d_out_pad - d_out))).astype(jnp.bfloat16)
    # Bake the class-padding mask into b2: padded W2 columns contribute exactly
    # 0, so a very negative bias makes padded logits ~ -1e30 -> exp == 0.
    b2p = jnp.pad(b2.astype(jnp.float32), ((0, 0), (0, d_out_pad - d_out)),
                  constant_values=-1e30)
    return w1p, b1p, w2p, b2p, d_out


def classifier1_forward(x, w1p, b1p, w2p, b2p, d_out, *, block_b=512,
                        out_dtype=jnp.float32, trim_padding=True):
    """Pallas forward of Classifier1 on prepared (padded/cast) parameters.

    x: (B, D_in) float32.  Returns (B, d_out) softmax probabilities
    (or the lane-padded (B, D_out_pad) buffer if trim_padding=False; the
    padded class columns are exact zeros).
    """
    B, D_in = x.shape
    H = w1p.shape[1]
    D_out_pad = w2p.shape[1]

    TB = _choose_tb(B, block_b)
    grid_b = pl.cdiv(B, TB)

    # Resident weights don't need a second pipeline buffer; only request
    # single-buffering when they are large enough to matter (v7x: 64 MiB VMEM).
    weight_bytes = (w1p.size + w2p.size) * 2 + (b1p.size + b2p.size) * 4
    single_buffer = weight_bytes > (4 << 20)
    # TODO(synk): add a K-tiled fallback (grid over H marked "arbitrary" with an
    # f32 VMEM accumulator) when weight_bytes approaches ~half the VMEM budget.

    def resident(shape):
        if single_buffer:
            return pl.BlockSpec(shape, lambda i: (0, 0),
                                pipeline_mode=pl.Buffered(1))
        return pl.BlockSpec(shape, lambda i: (0, 0))

    out = pl.pallas_call(
        _mlp_softmax_kernel,
        out_shape=jax.ShapeDtypeStruct((B, D_out_pad), out_dtype),
        grid=(grid_b,),
        in_specs=[
            pl.BlockSpec((TB, D_in), lambda i: (i, 0)),   # x: tiled over batch
            resident((D_in, H)),                          # W1: VMEM-resident
            resident((1, H)),                             # b1
            resident((H, D_out_pad)),                     # W2
            resident((1, D_out_pad)),                     # b2 (mask baked in)
        ],
        out_specs=pl.BlockSpec((TB, D_out_pad), lambda i: (i, 0)),
        compiler_params=pltpu.CompilerParams(
            dimension_semantics=("parallel",),
            vmem_limit_bytes=_vmem_limit_bytes(),
        ),
    )(x.astype(jnp.float32), w1p, b1p, w2p, b2p)

    if trim_padding and D_out_pad != d_out:
        out = out[:, :d_out]
    return out


def init_params(key, input_size, hidden_size, output_size):
    """Deterministic init mirroring nn.Linear default (uniform +/- 1/sqrt(fan_in))."""
    k1, k2, k3, k4 = jax.random.split(key, 4)
    bound1 = 1.0 / jnp.sqrt(input_size)
    bound2 = 1.0 / jnp.sqrt(hidden_size)
    w1 = jax.random.uniform(k1, (input_size, hidden_size), jnp.float32, -bound1, bound1)
    b1 = jax.random.uniform(k2, (1, hidden_size), jnp.float32, -bound1, bound1)
    w2 = jax.random.uniform(k3, (hidden_size, output_size), jnp.float32, -bound2, bound2)
    b2 = jax.random.uniform(k4, (1, output_size), jnp.float32, -bound2, bound2)
    return w1, b1, w2, b2


if __name__ == "__main__":
    input_size, hidden_size, output_size = 32, 32, 16
    batch = 8

    key = jax.random.PRNGKey(0)
    kx, kp = jax.random.split(key)
    x = jax.random.normal(kx, (batch, input_size), jnp.float32)
    w1, b1, w2, b2 = init_params(kp, input_size, hidden_size, output_size)

    # Pad/cast the parameters once (outside the per-call path), then run.
    w1p, b1p, w2p, b2p, d_out = prepare_params(w1, b1, w2, b2)
    out = classifier1_forward(x, w1p, b1p, w2p, b2p, d_out)
    jax.block_until_ready(out)

    # Reference in plain JAX, emulating the same bf16-operand / f32-accumulate
    # matmul precision used inside the kernel.
    xb = x.astype(jnp.bfloat16).astype(jnp.float32)
    w1b = w1.astype(jnp.bfloat16).astype(jnp.float32)
    w2b = w2.astype(jnp.bfloat16).astype(jnp.float32)
    h_ref = jnp.maximum(xb @ w1b + b1, 0.0)
    logits_ref = h_ref.astype(jnp.bfloat16).astype(jnp.float32) @ w2b + b2
    ref = jax.nn.softmax(logits_ref, axis=1)

    assert out.shape == (batch, output_size)
    assert jnp.all(jnp.isfinite(out))
    assert jnp.allclose(out, ref, atol=5e-3, rtol=1e-3)
    assert jnp.allclose(jnp.sum(out, axis=1), 1.0, atol=5e-3)

    print("KERNEL_OK")
</pallas_src>

<mosaic_0001>
module attributes {stable_mosaic.version = 11 : i64} {
  func.func @_mlp_softmax_kernel(%arg0: i32, %arg1: memref<8x32xf32, #tpu.memory_space<vmem>>, %arg2: memref<32x32xbf16, #tpu.memory_space<vmem>>, %arg3: memref<1x32xf32, #tpu.memory_space<vmem>>, %arg4: memref<32x128xbf16, #tpu.memory_space<vmem>>, %arg5: memref<1x128xf32, #tpu.memory_space<vmem>>, %arg6: memref<8x128xf32, #tpu.memory_space<vmem>>) attributes {dimension_semantics = [#tpu.dimension_semantics<parallel>], iteration_bounds = array<i64: 1>, scalar_prefetch = 0 : i64, scratch_operands = 0 : i64, tpu.core_type = #tpu.core_type<tc>, window_params = [{transform_indices = @transform_0, window_bounds = array<i64: 8, 32>}, {pipeline_mode = #tpu.pipeline_mode<synchronous>, transform_indices = @transform_1, window_bounds = array<i64: 32, 32>}, {pipeline_mode = #tpu.pipeline_mode<synchronous>, transform_indices = @transform_2, window_bounds = array<i64: 1, 32>}, {pipeline_mode = #tpu.pipeline_mode<synchronous>, transform_indices = @transform_3, window_bounds = array<i64: 32, 128>}, {pipeline_mode = #tpu.pipeline_mode<synchronous>, transform_indices = @transform_4, window_bounds = array<i64: 1, 128>}, {transform_indices = @transform_5, window_bounds = array<i64: 8, 128>}]} {
    %c0 = arith.constant 0 : index
    %c0_0 = arith.constant 0 : index
    %0 = vector.load %arg1[%c0, %c0_0] : memref<8x32xf32, #tpu.memory_space<vmem>>, vector<8x32xf32>
    %1 = arith.truncf %0 : vector<8x32xf32> to vector<8x32xbf16>
    %c0_1 = arith.constant 0 : index
    %c0_2 = arith.constant 0 : index
    %2 = vector.load %arg2[%c0_1, %c0_2] : memref<32x32xbf16, #tpu.memory_space<vmem>>, vector<32x32xbf16>
    %cst = arith.constant dense<0.000000e+00> : vector<8x32xf32>
    %3 = tpu.matmul %1, %2, %cst {dimension_numbers = #tpu.dot_dimension_numbers<[1], [0], [0], [1], [0, 0, 1, 1], [], []>} : vector<8x32xbf16>, vector<32x32xbf16>, vector<8x32xf32> -> vector<8x32xf32>
    %c0_3 = arith.constant 0 : index
    %c0_4 = arith.constant 0 : index
    %4 = vector.load %arg3[%c0_3, %c0_4] : memref<1x32xf32, #tpu.memory_space<vmem>>, vector<1x32xf32>
    %5 = vector.broadcast %4 : vector<1x32xf32> to vector<8x32xf32>
    %6 = arith.addf %3, %5 : vector<8x32xf32>
    %cst_5 = arith.constant 0.000000e+00 : f32
    %7 = vector.broadcast %cst_5 : f32 to vector<8x32xf32>
    %8 = arith.maximumf %6, %7 : vector<8x32xf32>
    %9 = arith.truncf %8 : vector<8x32xf32> to vector<8x32xbf16>
    %c0_6 = arith.constant 0 : index
    %c0_7 = arith.constant 0 : index
    %10 = vector.load %arg4[%c0_6, %c0_7] : memref<32x128xbf16, #tpu.memory_space<vmem>>, vector<32x128xbf16>
    %cst_8 = arith.constant dense<0.000000e+00> : vector<8x128xf32>
    %11 = tpu.matmul %9, %10, %cst_8 {dimension_numbers = #tpu.dot_dimension_numbers<[1], [0], [0], [1], [0, 0, 1, 1], [], []>} : vector<8x32xbf16>, vector<32x128xbf16>, vector<8x128xf32> -> vector<8x128xf32>
    %c0_9 = arith.constant 0 : index
    %c0_10 = arith.constant 0 : index
    %12 = vector.load %arg5[%c0_9, %c0_10] : memref<1x128xf32, #tpu.memory_space<vmem>>, vector<1x128xf32>
    %13 = vector.broadcast %12 : vector<1x128xf32> to vector<8x128xf32>
    %14 = arith.addf %11, %13 : vector<8x128xf32>
    %cst_11 = arith.constant dense<0xFF800000> : vector<8xf32>
    %15 = vector.multi_reduction <maximumf>, %14, %cst_11 [1] : vector<8x128xf32> to vector<8xf32>
    %16 = vector.shape_cast %15 : vector<8xf32> to vector<8x1xf32>
    %17 = vector.broadcast %16 : vector<8x1xf32> to vector<8x128xf32>
    %18 = arith.subf %14, %17 : vector<8x128xf32>
    %19 = math.exp %18 : vector<8x128xf32>
    %cst_12 = arith.constant dense<0.000000e+00> : vector<8xf32>
    %20 = vector.multi_reduction <add>, %19, %cst_12 [1] : vector<8x128xf32> to vector<8xf32>
    %21 = vector.shape_cast %20 : vector<8xf32> to vector<8x1xf32>
    %22 = tpu.reciprocal %21 {approx = true} : vector<8x1xf32> -> vector<8x1xf32>
    %23 = vector.broadcast %22 : vector<8x1xf32> to vector<8x128xf32>
    %24 = arith.mulf %19, %23 : vector<8x128xf32>
    %c0_13 = arith.constant 0 : index
    %c0_14 = arith.constant 0 : index
    %25 = vector.load %arg6[%c0_13, %c0_14] : memref<8x128xf32, #tpu.memory_space<vmem>>, vector<8x128xf32>
    tpu.vector_store %arg6[%c0_13, %c0_14], %24 {strides = array<i32>} : memref<8x128xf32, #tpu.memory_space<vmem>>, vector<8x128xf32>,
    return
  }
  func.func @transform_0(%arg0: i32) -> (i32, i32) {
    %c0_i32 = arith.constant 0 : i32
    %c0_i32_0 = arith.constant 0 : i32
    return %arg0, %c0_i32 : i32, i32
  }
  func.func @transform_1(%arg0: i32) -> (i32, i32) {
    %c0_i32 = arith.constant 0 : i32
    %c0_i32_0 = arith.constant 0 : i32
    %c0_i32_1 = arith.constant 0 : i32
    return %c0_i32, %c0_i32_0 : i32, i32
  }
  func.func @transform_2(%arg0: i32) -> (i32, i32) {
    %c0_i32 = arith.constant 0 : i32
    %c0_i32_0 = arith.constant 0 : i32
    %c0_i32_1 = arith.constant 0 : i32
    return %c0_i32, %c0_i32_0 : i32, i32
  }
  func.func @transform_3(%arg0: i32) -> (i32, i32) {
    %c0_i32 = arith.constant 0 : i32
    %c0_i32_0 = arith.constant 0 : i32
    %c0_i32_1 = arith.constant 0 : i32
    return %c0_i32, %c0_i32_0 : i32, i32
  }
  func.func @transform_4(%arg0: i32) -> (i32, i32) {
    %c0_i32 = arith.constant 0 : i32
    %c0_i32_0 = arith.constant 0 : i32
    %c0_i32_1 = arith.constant 0 : i32
    return %c0_i32, %c0_i32_0 : i32, i32
  }
  func.func @transform_5(%arg0: i32) -> (i32, i32) {
    %c0_i32 = arith.constant 0 : i32
    %c0_i32_0 = arith.constant 0 : i32
    return %arg0, %c0_i32 : i32, i32
  }
}

</mosaic_0001>

<bundles_post_ra>
// kernel: tpu_custom_call.1
= control target key start
LH: loop header
LB: loop body
LE: loop exit
PB: predicated region body
PF: predicated region fallthrough
CT: control target
= control target key end

     0   :  { %10 = vsyncpa [#allocation3], 0  ;;  %s412_s0 = inlined_call_operand.hbm [shape: f32[8,32], index: 0, kind: input, shape index: {}]   ;;  %s413_s1 = inlined_call_operand.hbm [shape: bf16[32,32], index: 1, kind: input, shape index: {}]   ;;  %s414_s2 = inlined_call_operand.vmem [shape: f32[1,32], index: 2, kind: input, shape index: {}]   ;;  %s415_s3 = inlined_call_operand.hbm [shape: bf16[32,128], index: 3, kind: input, shape index: {}]   ;;  %s416_s4 = inlined_call_operand.vmem [shape: f32[1,128], index: 4, kind: input, shape index: {}]   ;;  %s417_s5 = inlined_call_operand.hbm [shape: f32[8,128], index: 5, kind: output, shape index: {}]  }
   0x1   :  { %11 = vsyncpa [#allocation6], 0 }
   0x2   :  { %12 = vsyncpa [#allocation4], 0  ;;  %s356_s18 = smov [#allocation5]  }
   0x3   :  { %s28_s19 = sshll.u32 %s356_s18, 4  ;;  %s29_s19 = int_to_ptr.vmem [resolvable:$true] %s28_s19 }
   0x4   :  { %s278_s20 = scalar_lea.vmem %s29_s19, 256  ;;  %p283_p1 = scmp.lt.s32.totalorder %s29_s19, %s29_s19 }
   0x5   :  { %p279_p0 = scmp.ne.s32.totalorder %s29_s19, %s278_s20  ;;  %p284_p2 = scmp.lt.s32.totalorder %s278_s20, %s278_s20 }
   0x7   :  { %p285_p3 = por %p284_p2, %p283_p1 }
   0x9   :  { %p286_p4 = pnand %p285_p3, %p279_p0 }
   0xb   :  { %289 = shalt.err (!%p286_p4)
}
   0xc   :  { %s357_s21 = smov 64   ;;  %s358_s22 = smov 4  }
   0xd   :  { %34 = dma.hbm_to_vmem [thread:$0]  %s413_s1, 256, %s29_s19, [#allocation6], %s357_s21, %s357_s21, %s358_s22  }
   0xe   :  { %s359_s25 = smov [#allocation2]   ;;  %s360_s27 = smov [#allocation7]  }
   0xf   :  { %s19_s26 = sshll.u32 %s359_s25, 4  ;;  %s42_s28 = sshll.u32 %s360_s27, 4  ;;  %s20_s26 = int_to_ptr.vmem [resolvable:$true] %s19_s26  ;;  %s43_s28 = int_to_ptr.vmem [resolvable:$true] %s42_s28 }
  0x10   :  { %s298_s29 = scalar_lea.vmem %s20_s26, 128  ;;  %p303_p6 = scmp.lt.s32.totalorder %s20_s26, %s20_s26 }
  0x11   :  { %p299_p5 = scmp.ne.s32.totalorder %s20_s26, %s298_s29  ;;  %p304_p7 = scmp.lt.s32.totalorder %s298_s29, %s298_s29 }
  0x13   :  { %p305_p8 = por %p304_p7, %p303_p6 }
  0x15   :  { %p306_p9 = pnand %p305_p8, %p299_p5 }
  0x17   :  { %309 = shalt.err (!%p306_p9)
}
  0x18   :  { %22 = dma.hbm_to_vmem [thread:$0]  %s412_s0, 128, %s20_s26, [#allocation3]  }
  0x19   :  { %s318_s7 = scalar_lea.vmem %s43_s28, 256  ;;  %p323_p11 = scmp.lt.s32.totalorder %s43_s28, %s43_s28 }
  0x1a   :  { %p319_p10 = scmp.ne.s32.totalorder %s43_s28, %s318_s7  ;;  %p324_p12 = scmp.lt.s32.totalorder %s318_s7, %s318_s7 }
  0x1c   :  { %p325_p13 = por %p324_p12, %p323_p11 }
  0x1e   :  { %p326_p0 = pnand %p325_p13, %p319_p10 }
  0x20   :  { %329 = shalt.err (!%p326_p0)
}
  0x21   :  { %48 = dma.hbm_to_vmem [thread:$0]  %s415_s3, 256, %s43_s28, [#allocation6], %s357_s21, %s357_s21, %s358_s22  }
  0x22   :  { %350 = dma.done.wait [#allocation3], 128  }
  0x23   :  { %351 = vsyncadd [#allocation3], 4294967168 }
  0x24   :  { %352 = dma.done.wait [#allocation6], 512  }
  0x25   :  { %353 = vsyncadd [#allocation6], 4294966784  ;;  %v361_v0 = vmov 0.0   ;;  %vm362_vm0 = vmmov 0   ;;  %v262_v1 = vld [vmem:[#allocation5 + $0x8] sm:$0xff]   ;;  %v263_v2 = vld [vmem:[#allocation5] sm:$0xff]  }
  0x26   :  { %238 = vmatprep.subr.bf16.mxu0 %v361_v0  ;;  %242 = vmatprep.mubr.msk.bf16.mxu0 %vm362_vm0, %v361_v0  ;;  %v61_v3 = vld [vmem:[#allocation2] sm:$0xff]  ;;  %vm86_vm1 = vcmask 261120   ;;  %v265_v6 = vld [vmem:[#allocation7] sm:$0xff]  }
  0x27   :  { %246 = vmatprep.subr.bf16.mxu1 %v361_v0  ;;  %250 = vmatprep.mubr.msk.bf16.mxu1 %vm362_vm0, %v361_v0  ;;  %v62_v4 = vpack.c.bf16 %v61_v3, %v61_v3  ;;  %v264_v5 = vld [vmem:[#allocation7 + $0x8] sm:$0xff]  }
  0x28   :  { %239 = vmatpush3.bf16.msra.mxu0 %v262_v1  ;;  %247 = vmatpush3.bf16.msra.mxu1 %v264_v5  ;;  %v224_v7 = vld [vmem:[%s414_s2] ss:$0 sm:$0xff]  ;;  %s363_s2 = smov [#allocation8]  }
  0x29   :  { %240 = vmatprep.subr.bf16.mxu0 %v361_v0  ;;  %248 = vmatprep.subr.bf16.mxu1 %v361_v0  ;;  %v228_v15 = vld [vmem:[%s416_s4] ss:$0 sm:$0xff]  ;;  %s214_s11 = sshll.u32 %s363_s2, 4  ;;  %s215_s11 = int_to_ptr.vmem [resolvable:$true] %s214_s11 }
  0x2a   :  { %s330_s4 = scalar_lea.vmem %s215_s11, 128  ;;  %p335_p2 = scmp.lt.s32.totalorder %s215_s11, %s215_s11 }
  0x2b   :  { %p331_p1 = scmp.ne.s32.totalorder %s215_s11, %s330_s4  ;;  %p336_p3 = scmp.lt.s32.totalorder %s330_s4, %s330_s4 }
  0x2c   :  { %241 = vmatpush3.bf16.msra.mxu0 %v263_v2  ;;  %249 = vmatpush3.bf16.msra.mxu1 %v265_v6 }
  0x2d   :  { %p337_p4 = por %p336_p3, %p335_p2 }
  0x2f   :  { %243 = vmatmul.mubr.msk.bf16.vlgmr.msra.gmra.mxu0 %vm86_vm1, %v62_v4  ;;  %p338_p5 = pnand %p337_p4, %p331_p1 }
  0xef   :  { %v124_v8 = vpop.f32.mrf.mxu0 }
  0xf0   :  { %v125_v9 = vadd.f32 %v224_v7, %v124_v8 }
  0xf1   :  { %v244_v10 = vpop.f32.mrf.mxu0 }
  0xf2   :  { %v130_v11 = vmax.f32 %v125_v9, 0.0 }
  0xf3   :  { %v127_v12 = vpop.f32.mrf.mxu0 }
  0xf4   :  { %v131_v13 = vpack.c.bf16 %v130_v11, %v130_v11 }
  0xf5   :  { %v245_v14 = vpop.f32.mrf.mxu0 }
  0xf6   :  { %251 = vmatmul.mubr.msk.bf16.vlgmr.msra.gmra.mxu1 %vm86_vm1, %v131_v13 }
 0x1b6   :  { %v192_v16 = vpop.f32.mrf.mxu1 }
 0x1b7   :  { %v193_v17 = vadd.f32 %v228_v15, %v192_v16 }
 0x1b8   :  { %v252_v18 = vpop.f32.mrf.mxu1 }
 0x1b9   :  { %198 = vmax.xlane.f32.xlu0 %v193_v17 }
 0x1ba   :  { %v195_v19 = vpop.f32.mrf.mxu1 }
 0x1bc   :  { %v253_v20 = vpop.f32.mrf.mxu1 }
 0x242   :  { %v199_v21 = vpop.xlane.xlu0 %198 }
 0x243   :  { %v200_v22 = vsub.f32 %v193_v17, %v199_v21 }
 0x245   :  { %v201_v23 = vmul.f32 1.442695, %v200_v22 }
 0x247   :  { %266 = vpow2.f32 %v201_v23 }
 0x254   :  { %v267_v24 = vpop.eup %266 }
 0x255   :  { %203 = vadd.xlane.f32.xlu0 %v267_v24 }
 0x2de   :  { %v204_v25 = vpop.xlane.xlu0 %203 }
 0x2df   :  { %268 = vrcp.f32 %v204_v25 }
 0x2ec   :  { %v269_v26 = vpop.eup %268 }
 0x2ed   :  { %v206_v27 = vmul.f32 %v269_v26, %v267_v24 }
 0x2ef   :  { %207 = vst [vmem:[#allocation8] sm:$0xff] %v206_v27 }
 0x2f0   :  { %341 = shalt.err (!%p338_p5)
}
 0x2f1   :  { %217 = dma.vmem_to_hbm [thread:$0]  %s215_s11, 128, %s417_s5, [#allocation4]  }
 0x2f2   :  { %354 = dma.done.wait [#allocation4], 128  }
 0x2f3   :  { %355 = vsyncadd [#allocation4], 4294967168 }
 0x2f4   :  { %221 = vsyncpa [#allocation3], 1 }
 0x2f5   :  { %222 = vsyncpa [#allocation6], 1 }
 0x2f6   :  { %223 = vsyncpa [#allocation4], 1 }

</bundles_post_ra>
